<compile_context>
chip_gen: v7x
topology: tpu7x:2x2x1
jax: 0.10.0
libtpu: 0.0.40
codegen_flags: <defaults>
</compile_context>

<pallas_src>
import functools

import jax
import jax.numpy as jnp
from jax import lax
from jax.experimental import pallas as pl
from jax.experimental.pallas import tpu as pltpu


# ---------------------------------------------------------------------------
# Kernels
# ---------------------------------------------------------------------------

def _gate_from_sum(channel_sum, w1_wide, b1_2d, w2_wide, b2_wide, inv_n):
    """(1, W) f32 channel sums -> (1, W) f32 lane-dense gate."""
    h = jnp.dot(channel_sum, w1_wide, preferred_element_type=jnp.float32)
    h = jnp.maximum(h * inv_n + b1_2d, 0.0)                         # (1, H)
    s = jnp.dot(h, w2_wide, preferred_element_type=jnp.float32)
    return jax.nn.sigmoid(s + b2_wide)                              # (1, W)


def _partial_sum_kernel(x_ref, psum_ref, *, tiles_per_part, valid_rows):
    """Pass 1: stream row tiles, accumulate masked channel sums per partition."""
    p = pl.program_id(0)
    t = pl.program_id(1)

    @pl.when(t == 0)
    def _():
        psum_ref[...] = jnp.zeros_like(psum_ref)

    tr = x_ref.shape[0]
    # Logical (pre-clamp) tile index -> global row ids; ragged / duplicate
    # (clamped) tiles are masked out entirely, so nothing is double counted.
    tile_idx = p * tiles_per_part + t
    row0 = tile_idx * tr
    row_ids = row0 + lax.broadcasted_iota(jnp.int32, (tr, 1), 0)
    xf = x_ref[...].astype(jnp.float32)
    xf = jnp.where(row_ids < valid_rows, xf, 0.0)
    psum_ref[...] += jnp.sum(xf, axis=0, keepdims=True)


def _scale_kernel(gate_ref, x_ref, o_ref):
    """Pass 2: broadcast-multiply each row tile by the lane-dense gate."""
    o_ref[...] = x_ref[...] * gate_ref[...]          # native dtype multiply


def _resident_kernel(x_ref, w1_ref, b1_ref, w2_ref, b2_ref, o_ref, *, inv_n):
    """Single-pass path: x resident in VMEM (one HBM read, one HBM write)."""
    channel_sum = jnp.sum(x_ref[...].astype(jnp.float32), axis=0, keepdims=True)
    g = _gate_from_sum(channel_sum, w1_ref[...], b1_ref[...], w2_ref[...],
                       b2_ref[...], inv_n)
    o_ref[...] = x_ref[...] * g.astype(o_ref.dtype)


# ---------------------------------------------------------------------------
# Wrapper
# ---------------------------------------------------------------------------

def _vmem_capacity_bytes():
    try:
        info = pltpu.get_tpu_info()
        cap = getattr(info, "vmem_capacity_bytes", None)
        if cap:
            return int(cap)
    except Exception:
        pass
    return 128 << 20  # v5e/v6e default


def senet_forward(x, w1, b1, w2, b2, *, tile_rows=None, resident_bytes_limit=None):
    """SENet forward.

    x: (N, C); w1: (H, C) [nn.Linear layout]; b1: (H,); w2: (C, H); b2: (C,).
    """
    N, C = x.shape
    H = w1.shape[0]
    orig_dtype = x.dtype
    itemsize = jnp.dtype(orig_dtype).itemsize

    vmem_cap = _vmem_capacity_bytes()

    # Lane-dense packing: GROUP consecutive rows share one 128-wide row.
    # TODO(synk): lane-sparse C (128 % C != 0 and C % 128 != 0) falls back to
    # group=1 (masked stores); could be hardened by padding C to 128.
    group = (128 // C) if (C <= 128 and 128 % C == 0) else 1
    W = group * C

    # Pre-arrange the (tiny) weights for the lane-dense layout:
    #   w1_wide[g*C + c, :] == w1[:, c]  -> (1,W) sum @ w1_wide == (1,C) sum @ w1.T
    #   w2_wide[:, g*C + c] == w2[c, :]  -> the gate comes out already lane-dense
    w1_wide = jnp.tile(jnp.transpose(w1), (group, 1)).astype(jnp.float32)   # (W, H)
    b1_2d = b1.reshape(1, H).astype(jnp.float32)                            # (1, H)
    w2_wide = jnp.tile(jnp.transpose(w2), (1, group)).astype(jnp.float32)   # (H, W)
    b2_wide = jnp.tile(b2.reshape(1, C), (1, group)).astype(jnp.float32)    # (1, W)

    inv_n = 1.0 / max(N, 1)
    x_bytes = N * C * itemsize

    # Generation-aware dispatch / tiling (v7x has 64 MiB VMEM, 3.2 TB/s HBM).
    if resident_bytes_limit is None:
        resident_bytes_limit = min(24 << 20, vmem_cap // 5)
    if tile_rows is None:
        tile_rows = 8192 if vmem_cap <= (64 << 20) else 4096

    # Pad only what the (rows, W) reshape requires (a multiple of `group`);
    # never pad rows up to a tile multiple (ragged tiles are masked in-kernel).
    rows = -(-N // group)
    n_pad = rows * group
    x_p = jnp.pad(x, ((0, n_pad - N), (0, 0))) if n_pad != N else x
    xr = x_p.reshape(rows, W)                    # metadata-only when no padding

    if x_bytes <= resident_bytes_limit:
        # -- Resident fast path: whole x/out in VMEM, single pass. -----------
        vmem_need = 2 * rows * W * itemsize + 4 * (2 * W * H + 2 * (H + W))
        out_r = pl.pallas_call(
            functools.partial(_resident_kernel, inv_n=inv_n),
            out_shape=jax.ShapeDtypeStruct((rows, W), orig_dtype),
            in_specs=[pl.BlockSpec(memory_space=pltpu.MemorySpace.VMEM)] * 5,
            out_specs=pl.BlockSpec(memory_space=pltpu.MemorySpace.VMEM),
            compiler_params=pltpu.CompilerParams(
                vmem_limit_bytes=min(vmem_cap, vmem_need + (8 << 20))),
        )(xr, w1_wide, b1_2d, w2_wide, b2_wide)
    else:
        # Sublane packing for the dtype: 8 rows (f32) / 16 (bf16) / 32 (int8).
        sub = 8 * max(1, 4 // itemsize)
        tr = min(tile_rows, -(-rows // sub) * sub)
        tiles = -(-rows // tr)
        n_parts = 2 if tiles >= 2 else 1          # split reduction over 2 TCs
        tiles_per_part = -(-tiles // n_parts)

        block_bytes = tr * W * itemsize
        limit1 = min(vmem_cap, 2 * block_bytes + (4 << 20))
        limit2 = min(vmem_cap, 4 * block_bytes + (4 << 20))

        # -- Pass 1: streamed partial channel sums (parallel over partitions).
        psums = pl.pallas_call(
            functools.partial(_partial_sum_kernel,
                              tiles_per_part=tiles_per_part, valid_rows=rows),
            out_shape=jax.ShapeDtypeStruct((n_parts, W), jnp.float32),
            grid=(n_parts, tiles_per_part),
            in_specs=[pl.BlockSpec(
                (tr, W),
                lambda p, t: (jnp.minimum(p * tiles_per_part + t, tiles - 1), 0))],
            out_specs=pl.BlockSpec((1, W), lambda p, t: (p, 0)),
            compiler_params=pltpu.CompilerParams(
                dimension_semantics=("parallel", "arbitrary"),
                vmem_limit_bytes=limit1),
        )(xr)

        # Tiny gate MLP on the summed partials (wrapper-side; a few small ops).
        channel_sum = jnp.sum(psums, axis=0, keepdims=True)
        gate = _gate_from_sum(channel_sum, w1_wide, b1_2d, w2_wide,
                              b2_wide, inv_n).astype(orig_dtype)

        # -- Pass 2: streamed broadcast scale (parallel -> megacore sharding).
        out_r = pl.pallas_call(
            _scale_kernel,
            out_shape=jax.ShapeDtypeStruct((rows, W), orig_dtype),
            grid=(tiles,),
            in_specs=[
                pl.BlockSpec((1, W), lambda i: (0, 0)),
                pl.BlockSpec((tr, W), lambda i: (i, 0)),
            ],
            out_specs=pl.BlockSpec((tr, W), lambda i: (i, 0)),
            compiler_params=pltpu.CompilerParams(
                dimension_semantics=("parallel",),
                vmem_limit_bytes=limit2),
        )(gate, xr)

    out = out_r.reshape(n_pad, C)
    return out[:N] if n_pad != N else out


# ---------------------------------------------------------------------------
# Pure-JAX reference (mirrors the PyTorch module)
# ---------------------------------------------------------------------------

def reference_forward(x, w1, b1, w2, b2):
    mean = jnp.mean(x.astype(jnp.float32), axis=0)        # (C,)
    h = jax.nn.relu(mean @ jnp.transpose(w1) + b1)         # (H,)
    s = jax.nn.sigmoid(h @ jnp.transpose(w2) + b2)         # (C,)
    return (x * s[None, :].astype(x.dtype)).astype(x.dtype)


if __name__ == "__main__":
    # Module config: in_channel=32, reduction_ratio=4 -> hidden=8
    in_channel = 32
    reduction_ratio = 4
    hidden = round(in_channel / reduction_ratio)

    key = jax.random.PRNGKey(0)
    k1, k2, k3, k4, kx = jax.random.split(key, 5)

    # nn.Linear parameter layout: weight (out, in), bias (out,)
    w1 = jax.random.normal(k1, (hidden, in_channel), jnp.float32) * 0.1
    b1 = jax.random.normal(k2, (hidden,), jnp.float32) * 0.1
    w2 = jax.random.normal(k3, (in_channel, hidden), jnp.float32) * 0.1
    b2 = jax.random.normal(k4, (in_channel,), jnp.float32) * 0.1

    cases = [
        (64, {}),                               # tiny: resident path
        (1001, {"resident_bytes_limit": 0}),    # streaming: pad-to-group + tail mask
        (8192, {}),                             # default dispatch (resident here)
        (40000, {"resident_bytes_limit": 0}),   # streaming: multi-tile, 2-way reduce
    ]
    for n, kwargs in cases:
        x = jax.random.normal(jax.random.fold_in(kx, n), (n, in_channel),
                              jnp.float32)
        out = jax.block_until_ready(senet_forward(x, w1, b1, w2, b2, **kwargs))
        ref = reference_forward(x, w1, b1, w2, b2)
        assert out.shape == x.shape, f"shape mismatch (N={n})"
        assert jnp.allclose(out, ref, atol=2e-3, rtol=2e-3), f"mismatch (N={n})"

    print("KERNEL_OK")
</pallas_src>

<mosaic_0001>
module attributes {stable_mosaic.version = 11 : i64} {
  func.func @_resident_kernel(%arg0: memref<16x128xf32, #tpu.memory_space<vmem>>, %arg1: memref<128x8xf32, #tpu.memory_space<vmem>>, %arg2: memref<1x8xf32, #tpu.memory_space<vmem>>, %arg3: memref<8x128xf32, #tpu.memory_space<vmem>>, %arg4: memref<1x128xf32, #tpu.memory_space<vmem>>, %arg5: memref<16x128xf32, #tpu.memory_space<vmem>>) attributes {dimension_semantics = [], scalar_prefetch = 0 : i64, scratch_operands = 0 : i64, tpu.core_type = #tpu.core_type<tc>} {
    %c0 = arith.constant 0 : index
    %c0_0 = arith.constant 0 : index
    %0 = vector.load %arg0[%c0, %c0_0] : memref<16x128xf32, #tpu.memory_space<vmem>>, vector<16x128xf32>
    %cst = arith.constant dense<0.000000e+00> : vector<128xf32>
    %1 = vector.multi_reduction <add>, %0, %cst [0] : vector<16x128xf32> to vector<128xf32>
    %2 = vector.shape_cast %1 : vector<128xf32> to vector<1x128xf32>
    %c0_1 = arith.constant 0 : index
    %c0_2 = arith.constant 0 : index
    %3 = vector.load %arg1[%c0_1, %c0_2] : memref<128x8xf32, #tpu.memory_space<vmem>>, vector<128x8xf32>
    %c0_3 = arith.constant 0 : index
    %c0_4 = arith.constant 0 : index
    %4 = vector.load %arg2[%c0_3, %c0_4] : memref<1x8xf32, #tpu.memory_space<vmem>>, vector<1x8xf32>
    %c0_5 = arith.constant 0 : index
    %c0_6 = arith.constant 0 : index
    %5 = vector.load %arg3[%c0_5, %c0_6] : memref<8x128xf32, #tpu.memory_space<vmem>>, vector<8x128xf32>
    %c0_7 = arith.constant 0 : index
    %c0_8 = arith.constant 0 : index
    %6 = vector.load %arg4[%c0_7, %c0_8] : memref<1x128xf32, #tpu.memory_space<vmem>>, vector<1x128xf32>
    %cst_9 = arith.constant dense<0.000000e+00> : vector<1x8xf32>
    %7 = tpu.matmul %2, %3, %cst_9 {dimension_numbers = #tpu.dot_dimension_numbers<[1], [0], [0], [1], [0, 0, 1, 1], [], []>} : vector<1x128xf32>, vector<128x8xf32>, vector<1x8xf32> -> vector<1x8xf32>
    %cst_10 = arith.constant 1.562500e-02 : f32
    %8 = vector.broadcast %cst_10 : f32 to vector<1x8xf32>
    %9 = arith.mulf %7, %8 : vector<1x8xf32>
    %10 = arith.addf %9, %4 : vector<1x8xf32>
    %cst_11 = arith.constant 0.000000e+00 : f32
    %11 = vector.broadcast %cst_11 : f32 to vector<1x8xf32>
    %12 = arith.maximumf %10, %11 : vector<1x8xf32>
    %cst_12 = arith.constant dense<0.000000e+00> : vector<1x128xf32>
    %13 = tpu.matmul %12, %5, %cst_12 {dimension_numbers = #tpu.dot_dimension_numbers<[1], [0], [0], [1], [0, 0, 1, 1], [], []>} : vector<1x8xf32>, vector<8x128xf32>, vector<1x128xf32> -> vector<1x128xf32>
    %14 = arith.addf %13, %6 : vector<1x128xf32>
    %15 = arith.negf %14 : vector<1x128xf32>
    %16 = math.exp %15 : vector<1x128xf32>
    %cst_13 = arith.constant 1.000000e+00 : f32
    %17 = vector.broadcast %cst_13 : f32 to vector<1x128xf32>
    %18 = arith.addf %17, %16 : vector<1x128xf32>
    %19 = arith.divf %17, %18 : vector<1x128xf32>
    %c0_14 = arith.constant 0 : index
    %c0_15 = arith.constant 0 : index
    %20 = vector.load %arg0[%c0_14, %c0_15] : memref<16x128xf32, #tpu.memory_space<vmem>>, vector<16x128xf32>
    %21 = vector.broadcast %19 : vector<1x128xf32> to vector<16x128xf32>
    %22 = arith.mulf %20, %21 : vector<16x128xf32>
    %c0_16 = arith.constant 0 : index
    %c0_17 = arith.constant 0 : index
    %23 = vector.load %arg5[%c0_16, %c0_17] : memref<16x128xf32, #tpu.memory_space<vmem>>, vector<16x128xf32>
    tpu.vector_store %arg5[%c0_16, %c0_17], %22 {strides = array<i32>} : memref<16x128xf32, #tpu.memory_space<vmem>>, vector<16x128xf32>,
    return
  }
}

</mosaic_0001>

<bundles_post_ra>
// kernel: tpu_custom_call.1
= control target key start
LH: loop header
LB: loop body
LE: loop exit
PB: predicated region body
PF: predicated region fallthrough
CT: control target
= control target key end

     0   :  { %v345_v3 = vmov 0.0|0.0   ;;  %vm346_vm0 = vmmov 0   ;;  %v347_v6 = vmov 0.0   ;;  %s464_s0 = inlined_call_operand.vmem [shape: f32[16,128], index: 0, kind: input, shape index: {}]   ;;  %s465_s1 = inlined_call_operand.vmem [shape: f32[128,8], index: 1, kind: input, shape index: {}]   ;;  %s466_s2 = inlined_call_operand.vmem [shape: f32[1,8], index: 2, kind: input, shape index: {}]   ;;  %s467_s3 = inlined_call_operand.vmem [shape: f32[8,128], index: 3, kind: input, shape index: {}]   ;;  %s468_s4 = inlined_call_operand.vmem [shape: f32[1,128], index: 4, kind: input, shape index: {}]   ;;  %s469_s5 = inlined_call_operand.hbm [shape: f32[16,128], index: 5, kind: output, shape index: {}]  }
   0x1   :  { %v30_v0 = vld [vmem:[%s465_s1] sm:$0xff]  ;;  %v31_v1 = vld [vmem:[%s465_s1 + $0x8] sm:$0xff]  ;;  %v32_v2 = vld [vmem:[%s465_s1 + $0x10] sm:$0xff]  ;;  %287 = vmatprep.subr.bf16.mxu0 %v345_v3  ;;  %279 = vmatprep.mubr.msk.f32.mxu0 %vm346_vm0, %v347_v6 }
   0x2   :  { %v288_v4 = vpack.c.bf16 %v31_v1, %v30_v0  ;;  %v33_v5 = vld [vmem:[%s465_s1 + $0x18] sm:$0xff]  ;;  %282 = vmatprep.subr.mxu1 %v347_v6  ;;  %284 = vmatprep.mubr.msk.f32.mxu1 %vm346_vm0, %v347_v6  ;;  %v34_v8 = vld [vmem:[%s465_s1 + $0x20] sm:$0xff]  ;;  %v35_v9 = vld [vmem:[%s465_s1 + $0x28] sm:$0xff] }
   0x3   :  { %v291_v7 = vpack.c.bf16 %v33_v5, %v32_v2  ;;  %v402_v10 = vld [vmem:[%s464_s0] sm:$0xff]  ;;  %v407_v11 = vld [vmem:[%s464_s0 + $0x8] sm:$0xff] }
   0x4   :  { %289 = vmatpush3.bf16.msra.mxu0 %v288_v4  ;;  %v23_v12 = vadd.f32 %v407_v11, %v402_v10 }
   0x5   :  { %290 = vmatprep.subr.bf16.mxu0 %v345_v3 }
   0x6   :  { %10 = vsyncpa [#allocation3], 0  ;;  %v294_v13 = vpack.c.bf16 %v35_v9, %v34_v8  ;;  %v36_v14 = vld [vmem:[%s465_s1 + $0x30] sm:$0xff]  ;;  %v37_v15 = vld [vmem:[%s465_s1 + $0x38] sm:$0xff]  ;;  %v24_v16 = vrot.slane %v23_v12, 4  ;;  %vm122_vm1 = vcmask 64512   ;;  %v202_v49 = vlaneseq }
   0x7   :  { %v297_v17 = vpack.c.bf16 %v37_v15, %v36_v14  ;;  %v38_v18 = vld [vmem:[%s465_s1 + $0x40] sm:$0xff]  ;;  %v39_v19 = vld [vmem:[%s465_s1 + $0x48] sm:$0xff]  ;;  %v40_v22 = vld [vmem:[%s465_s1 + $0x50] sm:$0xff] }
   0x8   :  { %292 = vmatpush3.bf16.msra.mxu0 %v291_v7  ;;  %v25_v20 = vadd.f32 %v24_v16, %v23_v12  ;;  %v300_v21 = vpack.c.bf16 %v39_v19, %v38_v18  ;;  %v41_v23 = vld [vmem:[%s465_s1 + $0x58] sm:$0xff]  ;;  %v42_v26 = vld [vmem:[%s465_s1 + $0x60] sm:$0xff]  ;;  %v43_v27 = vld [vmem:[%s465_s1 + $0x68] sm:$0xff]  ;;  %v203_v50 = vshrl.u32 %v202_v49, 7 }
   0x9   :  { %293 = vmatprep.subr.bf16.mxu0 %v345_v3  ;;  %v303_v25 = vpack.c.bf16 %v41_v23, %v40_v22  ;;  %v306_v29 = vpack.c.bf16 %v43_v27, %v42_v26  ;;  %v44_v30 = vld [vmem:[%s465_s1 + $0x70] sm:$0xff]  ;;  %v45_v31 = vld [vmem:[%s465_s1 + $0x78] sm:$0xff]  ;;  %v47_v35 = vld [vmem:[%s467_s3] sm:$0xff] }
   0xa   :  { %v26_v24 = vrot.slane %v25_v20, 2  ;;  %v309_v33 = vpack.c.bf16 %v45_v31, %v44_v30  ;;  %283 = vmatpush3.msra.mxu1 %v47_v35  ;;  %v46_v36 = vld [vmem:[%s466_s2] sm:$0x1]  ;;  %v204_v51 = vsub.s32 0, %v203_v50  ;;  %s348_s2 = smov [#allocation2]  }
   0xb   :  { %v48_v42 = vld [vmem:[%s468_s4] sm:$0x1]  ;;  %s215_s3 = sshll.u32 %s348_s2, 4  ;;  %s216_s3 = int_to_ptr.vmem [resolvable:$true] %s215_s3 }
   0xc   :  { %295 = vmatpush3.bf16.msra.mxu0 %v294_v13  ;;  %v27_v28 = vadd.f32 %v26_v24, %v25_v20  ;;  %s321_s4 = scalar_lea.vmem %s216_s3, 256  ;;  %p326_p1 = scmp.lt.s32.totalorder %s216_s3, %s216_s3 }
   0xd   :  { %296 = vmatprep.subr.bf16.mxu0 %v345_v3  ;;  %p322_p0 = scmp.ne.s32.totalorder %s216_s3, %s321_s4  ;;  %p327_p2 = scmp.lt.s32.totalorder %s321_s4, %s321_s4 }
   0xe   :  { %v28_v32 = vrot.slane %v27_v28, 1 }
   0xf   :  { %p328_p3 = por %p327_p2, %p326_p1 }
  0x10   :  { %298 = vmatpush3.bf16.msra.mxu0 %v297_v17  ;;  %v29_v34 = vadd.f32 %v28_v32, %v27_v28 }
  0x11   :  { %299 = vmatprep.subr.bf16.mxu0 %v345_v3  ;;  %p329_p4 = pnand %p328_p3, %p322_p0 }
  0x14   :  { %301 = vmatpush3.bf16.msra.mxu0 %v300_v21 }
  0x15   :  { %302 = vmatprep.subr.bf16.mxu0 %v345_v3 }
  0x18   :  { %304 = vmatpush3.bf16.msra.mxu0 %v303_v25 }
  0x19   :  { %305 = vmatprep.subr.bf16.mxu0 %v345_v3 }
  0x1c   :  { %307 = vmatpush3.bf16.msra.mxu0 %v306_v29 }
  0x1d   :  { %308 = vmatprep.subr.bf16.mxu0 %v345_v3 }
  0x20   :  { %310 = vmatpush3.bf16.msra.mxu0 %v309_v33 }
  0x23   :  { %280 = vmatmul.mubr.f32.vlgmr.msra.gmra.mrb[0].mxu0 %v29_v34 }
  0xf6   :  { %v115_v37 = vpop.f32.mrb[0].mxu0 }
  0xf7   :  { %v119_v38 = vmul.f32 0.015625, %v115_v37  ;;  %v281_v39 = vpop.f32.mrb[1].mxu0 }
  0xf9   :  { %v120_v40 = vadd.f32 %v119_v38, %v46_v36 }
  0xfb   :  { %v121_v41 = vmax.f32 %v120_v40, 0.0 }
  0xfd   :  { %285 = vmatmul.mubr.msk.f32.vlgmr.msra.gmra.mrb[0].mxu1 %vm122_vm1, %v121_v41 }
 0x1d0   :  { %v192_v43 = vpop.f32.mrb[0].mxu1 }
 0x1d1   :  { %v193_v44 = vadd.f32 %v192_v43, %v48_v42  ;;  %v286_v45 = vpop.f32.mrb[1].mxu1 }
 0x1d3   :  { %v227_v46 = vmul.f32 -1.442695, %v193_v44 }
 0x1d5   :  { %317 = vpow2.f32 %v227_v46 }
 0x1df   :  { %v318_v47 = vpop.eup %317 }
 0x1e0   :  { %v199_v48 = vadd.f32 1.0, %v318_v47 }
 0x1e2   :  { %319 = vrcp.f32 %v199_v48 }
 0x1ec   :  { %v320_v52 = vpop.eup %319 }
 0x1ed   :  { %v205_v53 = vrot.slane %v320_v52, %v204_v51 }
 0x1ef   :  { %v206_v54 = vmul.f32 %v205_v53, %v402_v10  ;;  %v207_v55 = vmul.f32 %v205_v53, %v407_v11 }
 0x1f1   :  { %208 = vst [vmem:[#allocation2] sm:$0xff] %v206_v54  ;;  %209 = vst [vmem:[#allocation2 + $0x8] sm:$0xff] %v207_v55 }
 0x1f2   :  { %332 = shalt.err (!%p329_p4)
}
 0x1f3   :  { %s333_s10 = scalar_lea.hbm %s469_s5, 256 }
 0x1f4   :  { %p334_p5 = scmp.ne.s32.totalorder %s469_s5, %s333_s10  ;;  %p337_p6 = scmp.lt.u32.totalorder %s333_s10, %s469_s5 }
 0x1f6   :  { %p339_p7 = pnand %p337_p6, %p334_p5 }
 0x1f8   :  { %342 = shalt.err (!%p339_p7)
}
 0x1f9   :  { %s349_s14 = smov 128   ;;  %s350_s15 = smov 8  }
 0x1fa   :  { %221 = dma.vmem_to_hbm [thread:$0]  %s216_s3, 256, %s469_s5, [#allocation3], %s349_s14, %s349_s14, %s350_s15  }
 0x1fb   :  { %343 = dma.done.wait [#allocation3], 256  }
 0x1fc   :  { %344 = vsyncadd [#allocation3], 4294967040 }
 0x1fd   :  { %225 = vsyncpa [#allocation3], 1 }

</bundles_post_ra>
